<compile_context>
chip_gen: v7x
topology: tpu7x:2x2x1
jax: 0.10.0
libtpu: 0.0.40
codegen_flags: <defaults>
</compile_context>

<pallas_src>
import jax
import jax.numpy as jnp
from jax.experimental import pallas as pl
from jax.experimental.pallas import tpu as pltpu


def _round_up(x, m):
    return (x + m - 1) // m * m


def gauss_mv_kernel(d_ref, e1_ref, e2_ref, g_ref, h2_ref, s_ref, o_ref, dsq_ref):
    # d_ref   : (tn, F)    f32   D tile (batch rows)
    # e1_ref  : (F, F*F)   f32   expansion: (d @ e1)[:, a*F + b] = d[:, a]
    # e2_ref  : (F, F*F)   f32   expansion: (d @ e2)[:, a*F + b] = d[:, b]
    # g_ref   : (F*F, tc)  bf16  flattened Gram matrices G_c = W_c^T W_c (transposed)
    # h2_ref  : (F, tc)    f32   -2 * (G_c z_c) (transposed)
    # s_ref   : (1, tc)    f32   z_c^T G_c z_c
    # o_ref   : (tn, tc)         output tile (batch on sublanes, channels on lanes)
    # dsq_ref : (tn, F*F)  bf16  scratch: cached D_j ⊗ D_j across the j sweep

    # Build Dsq once per i-tile (j is the inner "arbitrary" axis, starts at 0).
    @pl.when(pl.program_id(1) == 0)
    def _():
        d = d_ref[...]
        a = jnp.dot(d, e1_ref[...], preferred_element_type=jnp.float32)
        b = jnp.dot(d, e2_ref[...], preferred_element_type=jnp.float32)
        dsq_ref[...] = (a * b).astype(jnp.bfloat16)

    # Main full-depth MXU pass + tiny 16-deep tail dot, f32 accumulation.
    acc = jnp.dot(dsq_ref[...], g_ref[...], preferred_element_type=jnp.float32)
    acc = acc + jnp.dot(d_ref[...], h2_ref[...], preferred_element_type=jnp.float32)
    acc = acc + s_ref[...]                      # sublane-broadcast (1, tc)
    o_ref[...] = (-jnp.maximum(acc, 0.0)).astype(o_ref.dtype)


def _tile_vmem_bytes(rows, cols, itemsize):
    return _round_up(rows, 32 // itemsize) * _round_up(cols, 128) * itemsize


def _vmem_plan_bytes(tn, tc, F, K1, out_itemsize):
    dbl = 2 * (_tile_vmem_bytes(tn, F, 4)            # D tile
               + 2 * _tile_vmem_bytes(F, K1, 4)      # E1, E2
               + _tile_vmem_bytes(K1, tc, 2)         # Gram (bf16)
               + _tile_vmem_bytes(F, tc, 4)          # -2 G z
               + _tile_vmem_bytes(1, tc, 4)          # z^T G z
               + _tile_vmem_bytes(tn, tc, out_itemsize))
    return dbl + _tile_vmem_bytes(tn, K1, 2)         # Dsq scratch (single-buffered)


def gauss_mv_forward(D, W, weight, *, tn=None, tc=None, out_dtype=jnp.float32):
    """Pallas implementation of Gauss_MV.forward.

    D      : (N, F)    float32
    W      : (C, F, F) float32   (self.W)
    weight : (F, C)    float32   (self.weight)
    returns: (N, C)    out_dtype (float32 by default)
    """
    C, F, F2 = W.shape
    assert F == F2
    N, Fd = D.shape
    assert Fd == F
    K1 = F * F
    out_itemsize = jnp.dtype(out_dtype).itemsize

    # ---- D-independent parameter preprocessing (tiny; plain JAX) -----------
    z = weight.T.astype(jnp.float32)                      # (C, F)
    Wf = W.astype(jnp.float32)
    G = jnp.einsum('crd,cre->cde', Wf, Wf)                # (C, F, F)   Gram
    h = jnp.einsum('cde,ce->cd', G, z)                    # (C, F)      G_c z_c
    s = jnp.einsum('cd,cd->c', z, h)                      # (C,)        z^T G z

    # ---- tiling -------------------------------------------------------------
    if tc is None:
        c128 = _round_up(C, 128)
        tc = c128 if c128 <= 2048 else 1024               # tc = C_pad when modest
    C_pad = _round_up(C, tc)

    n8 = _round_up(N, 8)
    if tn is None:
        tn = 1024
        while tn > 128 and _vmem_plan_bytes(tn, tc, F, K1, out_itemsize) > 24 * 1024 * 1024:
            tn //= 2
        if n8 <= tn:
            # small batch: one tile; if big enough, split in two so v7x's 2nd TC has work
            tn = n8 if n8 <= 512 else _round_up((n8 + 1) // 2, 8)
    N_pad = _round_up(N, tn)

    # ---- kernel operands (all small except D) -------------------------------
    Dp = jnp.pad(D.astype(jnp.float32), ((0, N_pad - N), (0, 0)))              # (N_pad, F)
    kk = jnp.arange(K1)[None, :]
    rr = jnp.arange(F)[:, None]
    E1 = (kk // F == rr).astype(jnp.float32)                                   # (F, K1)
    E2 = (kk % F == rr).astype(jnp.float32)                                    # (F, K1)
    Gt = jnp.pad(G.reshape(C, K1).T.astype(jnp.bfloat16),
                 ((0, 0), (0, C_pad - C)))                                     # (K1, C_pad)
    H2 = jnp.pad((-2.0 * h).T.astype(jnp.float32), ((0, 0), (0, C_pad - C)))   # (F, C_pad)
    S = jnp.pad(s.astype(jnp.float32)[None, :], ((0, 0), (0, C_pad - C)))      # (1, C_pad)

    vmem_limit = int(min(max(_vmem_plan_bytes(tn, tc, F, K1, out_itemsize) + 4 * 2**20,
                             32 * 2**20), 56 * 2**20))

    cost = pl.CostEstimate(
        flops=2 * N_pad * C_pad * (K1 + F) + 4 * N_pad * K1 * F,
        transcendentals=0,
        bytes_accessed=(N_pad * F * 4 + 2 * F * K1 * 4 + K1 * C_pad * 2
                        + F * C_pad * 4 + C_pad * 4 + N_pad * C_pad * out_itemsize))

    out_pad = pl.pallas_call(
        gauss_mv_kernel,
        out_shape=jax.ShapeDtypeStruct((N_pad, C_pad), out_dtype),
        grid_spec=pltpu.PrefetchScalarGridSpec(
            num_scalar_prefetch=0,
            grid=(N_pad // tn, C_pad // tc),
            in_specs=[
                pl.BlockSpec((tn, F), lambda i, j: (i, 0)),     # D tile (no re-fetch over j)
                pl.BlockSpec((F, K1), lambda i, j: (0, 0)),     # E1 (resident)
                pl.BlockSpec((F, K1), lambda i, j: (0, 0)),     # E2 (resident)
                pl.BlockSpec((K1, tc), lambda i, j: (0, j)),    # flattened Gram
                pl.BlockSpec((F, tc), lambda i, j: (0, j)),     # -2 G z
                pl.BlockSpec((1, tc), lambda i, j: (0, j)),     # z^T G z
            ],
            out_specs=pl.BlockSpec((tn, tc), lambda i, j: (i, j)),
            scratch_shapes=[pltpu.VMEM((tn, K1), jnp.bfloat16)],
        ),
        compiler_params=pltpu.CompilerParams(
            dimension_semantics=("parallel", "arbitrary"),
            vmem_limit_bytes=vmem_limit),
        cost_estimate=cost,
    )(Dp, E1, E2, Gt, H2, S)

    return out_pad[:N, :C]


def gauss_mv_ref(D, W, weight):
    """Plain-JAX mirror of the PyTorch forward (for validation)."""
    WDt = jnp.einsum('crd,jd->crj', W, D)                  # torch.matmul(W, D.t())
    WZ = jnp.einsum('crd,dc->cr', W, weight)
    DMZ = jnp.einsum('crj,cr->jc', WDt, WZ)
    out = jnp.sum(WDt ** 2, axis=1).T
    out = out - 2.0 * DMZ
    out = out + jnp.sum(WZ ** 2, axis=1)[None, :]
    return -jax.nn.relu(out)


if __name__ == "__main__":
    # Small, module-consistent shapes.
    N, F, C = 8, 16, 256          # batch, in_features, out_features
    gamma = 2.0

    key = jax.random.PRNGKey(0)
    kd, kw = jax.random.split(key)

    # Deterministic "parameters" mirroring Gauss_MV.__init__:
    #   W = einsum('k,il->kil', gamma*ones(C), eye(F))  -> gamma * I per channel
    #   weight ~ U(5/gamma^2, 50/gamma^2), shape (F, C)
    W = gamma * jnp.broadcast_to(jnp.eye(F, dtype=jnp.float32), (C, F, F))
    weight = jax.random.uniform(kw, (F, C), dtype=jnp.float32,
                                minval=5.0 / gamma ** 2, maxval=50.0 / gamma ** 2)
    D = jax.random.normal(kd, (N, F), dtype=jnp.float32)

    out = jax.block_until_ready(gauss_mv_forward(D, W, weight))
    ref = gauss_mv_ref(D, W, weight)
    assert out.shape == (N, C), out.shape
    max_err = float(jnp.max(jnp.abs(out - ref)))
    assert jnp.allclose(out, ref, rtol=2e-2, atol=1e-1), max_err

    # TODO(synk): conf()/prox() of the module are trivial wrappers (exp / no-op)
    # and are not kernelized here.
    print("KERNEL_OK")
</pallas_src>

<mosaic_0001>
module attributes {stable_mosaic.version = 11 : i64} {
  func.func @gauss_mv_kernel(%arg0: i32, %arg1: i32, %arg2: memref<8x16xf32, #tpu.memory_space<vmem>>, %arg3: memref<16x256xf32, #tpu.memory_space<vmem>>, %arg4: memref<16x256xf32, #tpu.memory_space<vmem>>, %arg5: memref<256x256xbf16, #tpu.memory_space<vmem>>, %arg6: memref<16x256xf32, #tpu.memory_space<vmem>>, %arg7: memref<1x256xf32, #tpu.memory_space<vmem>>, %arg8: memref<8x256xf32, #tpu.memory_space<vmem>>, %arg9: memref<8x256xbf16, #tpu.memory_space<vmem>>) attributes {dimension_semantics = [#tpu.dimension_semantics<parallel>, #tpu.dimension_semantics<arbitrary>], iteration_bounds = array<i64: 1, 1>, scalar_prefetch = 0 : i64, scratch_operands = 1 : i64, tpu.core_type = #tpu.core_type<tc>, window_params = [{transform_indices = @transform_0, window_bounds = array<i64: 8, 16>}, {pipeline_mode = #tpu.pipeline_mode<synchronous>, transform_indices = @transform_1, window_bounds = array<i64: 16, 256>}, {pipeline_mode = #tpu.pipeline_mode<synchronous>, transform_indices = @transform_2, window_bounds = array<i64: 16, 256>}, {transform_indices = @transform_3, window_bounds = array<i64: 256, 256>}, {transform_indices = @transform_4, window_bounds = array<i64: 16, 256>}, {transform_indices = @transform_5, window_bounds = array<i64: 1, 256>}, {transform_indices = @transform_6, window_bounds = array<i64: 8, 256>}]} {
    %c0_i32 = arith.constant 0 : i32
    %0 = arith.cmpi eq, %arg1, %c0_i32 : i32
    %1 = arith.extui %0 : i1 to i32
    %c0_i32_0 = arith.constant 0 : i32
    %2 = arith.cmpi ne, %1, %c0_i32_0 : i32
    scf.if %2 {
      %c0_15 = arith.constant 0 : index
      %c0_16 = arith.constant 0 : index
      %18 = vector.load %arg2[%c0_15, %c0_16] : memref<8x16xf32, #tpu.memory_space<vmem>>, vector<8x16xf32>
      %c0_17 = arith.constant 0 : index
      %c0_18 = arith.constant 0 : index
      %19 = vector.load %arg3[%c0_17, %c0_18] : memref<16x256xf32, #tpu.memory_space<vmem>>, vector<16x256xf32>
      %cst_19 = arith.constant dense<0.000000e+00> : vector<8x256xf32>
      %20 = tpu.matmul %18, %19, %cst_19 {dimension_numbers = #tpu.dot_dimension_numbers<[1], [0], [0], [1], [0, 0, 1, 1], [], []>} : vector<8x16xf32>, vector<16x256xf32>, vector<8x256xf32> -> vector<8x256xf32>
      %c0_20 = arith.constant 0 : index
      %c0_21 = arith.constant 0 : index
      %21 = vector.load %arg4[%c0_20, %c0_21] : memref<16x256xf32, #tpu.memory_space<vmem>>, vector<16x256xf32>
      %cst_22 = arith.constant dense<0.000000e+00> : vector<8x256xf32>
      %22 = tpu.matmul %18, %21, %cst_22 {dimension_numbers = #tpu.dot_dimension_numbers<[1], [0], [0], [1], [0, 0, 1, 1], [], []>} : vector<8x16xf32>, vector<16x256xf32>, vector<8x256xf32> -> vector<8x256xf32>
      %23 = arith.mulf %20, %22 : vector<8x256xf32>
      %24 = arith.truncf %23 : vector<8x256xf32> to vector<8x256xbf16>
      %c0_23 = arith.constant 0 : index
      %c0_24 = arith.constant 0 : index
      %25 = vector.load %arg9[%c0_23, %c0_24] : memref<8x256xbf16, #tpu.memory_space<vmem>>, vector<8x256xbf16>
      tpu.vector_store %arg9[%c0_23, %c0_24], %24 {strides = array<i32>} : memref<8x256xbf16, #tpu.memory_space<vmem>>, vector<8x256xbf16>,
    } else {
    }
    %c0 = arith.constant 0 : index
    %c0_1 = arith.constant 0 : index
    %3 = vector.load %arg9[%c0, %c0_1] : memref<8x256xbf16, #tpu.memory_space<vmem>>, vector<8x256xbf16>
    %c0_2 = arith.constant 0 : index
    %c0_3 = arith.constant 0 : index
    %4 = vector.load %arg5[%c0_2, %c0_3] : memref<256x256xbf16, #tpu.memory_space<vmem>>, vector<256x256xbf16>
    %cst = arith.constant dense<0.000000e+00> : vector<8x256xf32>
    %5 = tpu.matmul %3, %4, %cst {dimension_numbers = #tpu.dot_dimension_numbers<[1], [0], [0], [1], [0, 0, 1, 1], [], []>} : vector<8x256xbf16>, vector<256x256xbf16>, vector<8x256xf32> -> vector<8x256xf32>
    %c0_4 = arith.constant 0 : index
    %c0_5 = arith.constant 0 : index
    %6 = vector.load %arg2[%c0_4, %c0_5] : memref<8x16xf32, #tpu.memory_space<vmem>>, vector<8x16xf32>
    %c0_6 = arith.constant 0 : index
    %c0_7 = arith.constant 0 : index
    %7 = vector.load %arg6[%c0_6, %c0_7] : memref<16x256xf32, #tpu.memory_space<vmem>>, vector<16x256xf32>
    %cst_8 = arith.constant dense<0.000000e+00> : vector<8x256xf32>
    %8 = tpu.matmul %6, %7, %cst_8 {dimension_numbers = #tpu.dot_dimension_numbers<[1], [0], [0], [1], [0, 0, 1, 1], [], []>} : vector<8x16xf32>, vector<16x256xf32>, vector<8x256xf32> -> vector<8x256xf32>
    %9 = arith.addf %5, %8 : vector<8x256xf32>
    %c0_9 = arith.constant 0 : index
    %c0_10 = arith.constant 0 : index
    %10 = vector.load %arg7[%c0_9, %c0_10] : memref<1x256xf32, #tpu.memory_space<vmem>>, vector<1x256xf32>
    %11 = vector.broadcast %10 : vector<1x256xf32> to vector<8x256xf32>
    %12 = arith.addf %9, %11 : vector<8x256xf32>
    %cst_11 = arith.constant 0.000000e+00 : f32
    %13 = vector.broadcast %cst_11 : f32 to vector<8x256xf32>
    %14 = arith.maximumf %12, %13 : vector<8x256xf32>
    %cst_12 = arith.constant 0.000000e+00 : f32
    %15 = vector.broadcast %cst_12 : f32 to vector<8x256xf32>
    %16 = arith.subf %15, %14 : vector<8x256xf32>
    %c0_13 = arith.constant 0 : index
    %c0_14 = arith.constant 0 : index
    %17 = vector.load %arg8[%c0_13, %c0_14] : memref<8x256xf32, #tpu.memory_space<vmem>>, vector<8x256xf32>
    tpu.vector_store %arg8[%c0_13, %c0_14], %16 {strides = array<i32>} : memref<8x256xf32, #tpu.memory_space<vmem>>, vector<8x256xf32>,
    return
  }
  func.func @transform_0(%arg0: i32, %arg1: i32) -> (i32, i32) {
    %c0_i32 = arith.constant 0 : i32
    %c0_i32_0 = arith.constant 0 : i32
    return %arg0, %c0_i32 : i32, i32
  }
  func.func @transform_1(%arg0: i32, %arg1: i32) -> (i32, i32) {
    %c0_i32 = arith.constant 0 : i32
    %c0_i32_0 = arith.constant 0 : i32
    %c0_i32_1 = arith.constant 0 : i32
    return %c0_i32, %c0_i32_0 : i32, i32
  }
  func.func @transform_2(%arg0: i32, %arg1: i32) -> (i32, i32) {
    %c0_i32 = arith.constant 0 : i32
    %c0_i32_0 = arith.constant 0 : i32
    %c0_i32_1 = arith.constant 0 : i32
    return %c0_i32, %c0_i32_0 : i32, i32
  }
  func.func @transform_3(%arg0: i32, %arg1: i32) -> (i32, i32) {
    %c0_i32 = arith.constant 0 : i32
    %c0_i32_0 = arith.constant 0 : i32
    return %c0_i32, %arg1 : i32, i32
  }
  func.func @transform_4(%arg0: i32, %arg1: i32) -> (i32, i32) {
    %c0_i32 = arith.constant 0 : i32
    %c0_i32_0 = arith.constant 0 : i32
    return %c0_i32, %arg1 : i32, i32
  }
  func.func @transform_5(%arg0: i32, %arg1: i32) -> (i32, i32) {
    %c0_i32 = arith.constant 0 : i32
    %c0_i32_0 = arith.constant 0 : i32
    return %c0_i32, %arg1 : i32, i32
  }
  func.func @transform_6(%arg0: i32, %arg1: i32) -> (i32, i32) {
    %c0_i32 = arith.constant 0 : i32
    return %arg0, %arg1 : i32, i32
  }
}

</mosaic_0001>

<bundles_post_ra>
// kernel: tpu_custom_call.1
= control target key start
LH: loop header
LB: loop body
LE: loop exit
PB: predicated region body
PF: predicated region fallthrough
CT: control target
= control target key end

     0   :  { %11 = vsyncpa [#allocation4], 0  ;;  %s1015_s0 = inlined_call_operand.hbm [shape: f32[8,16], index: 0, kind: input, shape index: {}]   ;;  %s1016_s1 = inlined_call_operand.hbm [shape: f32[16,256], index: 1, kind: input, shape index: {}]   ;;  %s1017_s2 = inlined_call_operand.hbm [shape: f32[16,256], index: 2, kind: input, shape index: {}]   ;;  %s1018_s3 = inlined_call_operand.hbm [shape: bf16[256,256], index: 3, kind: input, shape index: {}]   ;;  %s1019_s4 = inlined_call_operand.hbm [shape: f32[16,256], index: 4, kind: input, shape index: {}]   ;;  %s1020_s5 = inlined_call_operand.vmem [shape: f32[1,256], index: 5, kind: input, shape index: {}]   ;;  %s1021_s6 = inlined_call_operand.hbm [shape: f32[8,256], index: 6, kind: output, shape index: {}]  }
   0x1   :  { %12 = vsyncpa [#allocation7], 0 }
   0x2   :  { %13 = vsyncpa [#allocation10], 0 }
   0x3   :  { %14 = vsyncpa [#allocation5], 0  ;;  %s870_s21 = smov [#allocation6]   ;;  %s730_s25 = scalar_lea.hbm %s1016_s1, 512 }
   0x4   :  { %s30_s22 = sshll.u32 %s870_s21, 4  ;;  %p731_p0 = scmp.ne.s32.totalorder %s1016_s1, %s730_s25  ;;  %s31_s22 = int_to_ptr.vmem [resolvable:$true] %s30_s22 }
   0x5   :  { %p734_p1 = scmp.lt.u32.totalorder %s730_s25, %s1016_s1 }
   0x7   :  { %p736_p2 = pnand %p734_p1, %p731_p0 }
   0x9   :  { %739 = shalt.err (!%p736_p2)
}
   0xa   :  { %s740_s30 = scalar_lea.vmem %s31_s22, 512  ;;  %p745_p4 = scmp.lt.s32.totalorder %s31_s22, %s31_s22 }
   0xb   :  { %p741_p3 = scmp.ne.s32.totalorder %s31_s22, %s740_s30  ;;  %p746_p5 = scmp.lt.s32.totalorder %s740_s30, %s740_s30 }
   0xd   :  { %p747_p6 = por %p746_p5, %p745_p4 }
   0xf   :  { %p748_p7 = pnand %p747_p6, %p741_p3 }
  0x11   :  { %751 = shalt.err (!%p748_p7)
}
  0x12   :  { %s871_s7 = smov 256   ;;  %s872_s8 = smov 16  }
  0x13   :  { %36 = dma.hbm_to_vmem [thread:$0]  %s1016_s1, 512, %s31_s22, [#allocation7], %s871_s7, %s871_s7, %s872_s8  }
  0x14   :  { %s873_s11 = smov [#allocation9]   ;;  %s752_s15 = scalar_lea.hbm %s1018_s3, 4096 }
  0x15   :  { %s54_s12 = sshll.u32 %s873_s11, 4  ;;  %p753_p8 = scmp.ne.s32.totalorder %s1018_s3, %s752_s15  ;;  %s55_s12 = int_to_ptr.vmem [resolvable:$true] %s54_s12 }
  0x16   :  { %p756_p9 = scmp.lt.u32.totalorder %s752_s15, %s1018_s3 }
  0x18   :  { %p758_p10 = pnand %p756_p9, %p753_p8 }
  0x1a   :  { %761 = shalt.err (!%p758_p10)
}
  0x1b   :  { %s762_s20 = scalar_lea.vmem %s55_s12, 4096  ;;  %p767_p12 = scmp.lt.s32.totalorder %s55_s12, %s55_s12 }
  0x1c   :  { %p763_p11 = scmp.ne.s32.totalorder %s55_s12, %s762_s20  ;;  %p768_p13 = scmp.lt.s32.totalorder %s762_s20, %s762_s20 }
  0x1e   :  { %p769_p0 = por %p768_p13, %p767_p12 }
  0x20   :  { %p770_p1 = pnand %p769_p0, %p763_p11 }
  0x22   :  { %773 = shalt.err (!%p770_p1)
}
  0x23   :  { %s874_s1 = smov 128   ;;  %s875_s21 = smov 8  }
  0x24   :  { %60 = dma.hbm_to_vmem [thread:$0]  %s1018_s3, 4096, %s55_s12, [#allocation10], %s874_s1, %s874_s1, %s875_s21  }
  0x25   :  { %s876_s24 = smov [#allocation3]   ;;  %s877_s26 = smov [#allocation8]  }
  0x26   :  { %s21_s25 = sshll.u32 %s876_s24, 4  ;;  %s42_s27 = sshll.u32 %s877_s26, 4  ;;  %s22_s25 = int_to_ptr.vmem [resolvable:$true] %s21_s25  ;;  %s943_s27 = int_to_ptr.vmem [resolvable:$true] %s42_s27 }
  0x27   :  { %s774_s30 = scalar_lea.hbm %s1015_s0, 128 }
  0x28   :  { %p775_p2 = scmp.ne.s32.totalorder %s1015_s0, %s774_s30  ;;  %p778_p3 = scmp.lt.u32.totalorder %s774_s30, %s1015_s0 }
  0x2a   :  { %p780_p4 = pnand %p778_p3, %p775_p2 }
  0x2c   :  { %783 = shalt.err (!%p780_p4)
}
  0x2d   :  { %s784_s3 = scalar_lea.vmem %s22_s25, 128  ;;  %p789_p6 = scmp.lt.s32.totalorder %s22_s25, %s22_s25 }
  0x2e   :  { %p785_p5 = scmp.ne.s32.totalorder %s22_s25, %s784_s3  ;;  %p790_p7 = scmp.lt.s32.totalorder %s784_s3, %s784_s3 }
  0x30   :  { %p791_p8 = por %p790_p7, %p789_p6 }
  0x32   :  { %p792_p9 = pnand %p791_p8, %p785_p5 }
  0x34   :  { %795 = shalt.err (!%p792_p9)
}
  0x35   :  { %24 = dma.hbm_to_vmem [thread:$0]  %s1015_s0, 128, %s22_s25, [#allocation4]  }
  0x36   :  { %s796_s17 = scalar_lea.hbm %s1017_s2, 512 }
  0x37   :  { %p797_p10 = scmp.ne.s32.totalorder %s1017_s2, %s796_s17  ;;  %p800_p11 = scmp.lt.u32.totalorder %s796_s17, %s1017_s2 }
  0x39   :  { %p802_p12 = pnand %p800_p11, %p797_p10 }
  0x3b   :  { %805 = shalt.err (!%p802_p12)
}
  0x3c   :  { %s806_s21 = scalar_lea.vmem %s943_s27, 512  ;;  %p811_p0 = scmp.lt.s32.totalorder %s943_s27, %s943_s27 }
  0x3d   :  { %p807_p13 = scmp.ne.s32.totalorder %s943_s27, %s806_s21  ;;  %p812_p1 = scmp.lt.s32.totalorder %s806_s21, %s806_s21 }
  0x3f   :  { %p813_p2 = por %p812_p1, %p811_p0 }
  0x41   :  { %p814_p3 = pnand %p813_p2, %p807_p13 }
  0x43   :  { %817 = shalt.err (!%p814_p3)
}
  0x44   :  { %48 = dma.hbm_to_vmem [thread:$0]  %s1017_s2, 512, %s943_s27, [#allocation7], %s871_s7, %s871_s7, %s872_s8  }
  0x45   :  { %s878_s23 = smov [#allocation11]   ;;  %s818_s28 = scalar_lea.hbm %s1019_s4, 512 }
  0x46   :  { %s66_s24 = sshll.u32 %s878_s23, 4  ;;  %p819_p4 = scmp.ne.s32.totalorder %s1019_s4, %s818_s28  ;;  %s67_s24 = int_to_ptr.vmem [resolvable:$true] %s66_s24 }
  0x47   :  { %p822_p5 = scmp.lt.u32.totalorder %s818_s28, %s1019_s4 }
  0x49   :  { %p824_p6 = pnand %p822_p5, %p819_p4 }
  0x4b   :  { %827 = shalt.err (!%p824_p6)
}
  0x4c   :  { %s828_s11 = scalar_lea.vmem %s67_s24, 512  ;;  %p833_p8 = scmp.lt.s32.totalorder %s67_s24, %s67_s24 }
  0x4d   :  { %p829_p7 = scmp.ne.s32.totalorder %s67_s24, %s828_s11  ;;  %p834_p9 = scmp.lt.s32.totalorder %s828_s11, %s828_s11 }
  0x4f   :  { %p835_p10 = por %p834_p9, %p833_p8 }
  0x51   :  { %p836_p11 = pnand %p835_p10, %p829_p7 }
  0x53   :  { %839 = shalt.err (!%p836_p11)
}
  0x54   :  { %72 = dma.hbm_to_vmem [thread:$0]  %s1019_s4, 512, %s67_s24, [#allocation10], %s871_s7, %s871_s7, %s872_s8  }
  0x55   :  { %862 = dma.done.wait [#allocation4], 128  }
  0x56   :  { %863 = vsyncadd [#allocation4], 4294967168 }
  0x57   :  { %864 = dma.done.wait [#allocation7], 1024  }
  0x58   :  { %865 = vsyncadd [#allocation7], 4294966272 }
  0x59   :  { %866 = dma.done.wait [#allocation10], 4608  }
  0x5a   :  { %867 = vsyncadd [#allocation10], 4294962688  ;;  %v879_v0 = vmov 0.0   ;;  %v96_v1 = vld [vmem:[#allocation6 + $0x8] sm:$0xff]  ;;  %v98_v2 = vld [vmem:[#allocation6 + $0x18] sm:$0xff]  ;;  %vm99_vm0 = vcmask 130048   ;;  %v583_v62 = vlaneseq }
  0x5b   :  { %167 = vmatprep.mubr.f32.mxu0 %v879_v0  ;;  %v95_v3 = vld [vmem:[#allocation6] sm:$0xff]  ;;  %v659_v4 = vpack.c.bf16 %v98_v2, %v96_v1  ;;  %v97_v5 = vld [vmem:[#allocation6 + $0x10] sm:$0xff]  ;;  %v175_v6 = vld [vmem:[#allocation8 + $0x8] sm:$0xff]  ;;  %s880_s8 = smov [#allocation12]  }
  0x5c   :  { %v661_v7 = vpack.c.bf16 %v97_v5, %v95_v3  ;;  %v992_v8 = vld [vmem:[#allocation3] sm:$0xff]  ;;  %v174_v10 = vld [vmem:[#allocation8] sm:$0xff]  ;;  %v176_v11 = vld [vmem:[#allocation8 + $0x10] sm:$0xff]  ;;  %v584_v63 = vshrl.u32 %v583_v62, 7  ;;  %s607_s13 = sshll.u32 %s880_s8, 4  ;;  %s608_s13 = int_to_ptr.vmem [resolvable:$true] %s607_s13 }
  0x5d   :  { %v177_v9 = vld [vmem:[#allocation8 + $0x18] sm:$0xff]  ;;  %660 = vmatprep.subr.bf16.mxu0 %v659_v4  ;;  %v682_v13 = vld [vmem:[#allocation9 + $0x4] ss:$8 sps:$4 sm:$0xff]   ;;  %v665_v14 = vpack.c.bf16 %v176_v11, %v174_v10  ;;  %v684_v15 = vld [vmem:[#allocation9] ss:$8 sps:$4 sm:$0xff]   ;;  %p845_p13 = scmp.lt.s32.totalorder %s608_s13, %s608_s13 }
  0x5e   :  { %v663_v12 = vpack.c.bf16 %v177_v9, %v175_v6  ;;  %662 = vmatpush1.bf16.msra.mxu0 %v661_v7  ;;  %540 = vmatprep.subr.bf16.mxu1 %v682_v13  ;;  %v685_v16 = vld [vmem:[#allocation9 + $0x14] ss:$8 sps:$4 sm:$0xff]   ;;  %v687_v17 = vld [vmem:[#allocation9 + $0x10] ss:$8 sps:$4 sm:$0xff]   ;;  %v688_v18 = vld [vmem:[#allocation9 + $0x24] ss:$8 sps:$4 sm:$0xff]  }
  0x5f   :  { %541 = vmatpush1.bf16.msra.mxu1 %v684_v15  ;;  %v690_v19 = vld [vmem:[#allocation9 + $0x20] ss:$8 sps:$4 sm:$0xff]   ;;  %v691_v20 = vld [vmem:[#allocation9 + $0x34] ss:$8 sps:$4 sm:$0xff]   ;;  %v693_v21 = vld [vmem:[#allocation9 + $0x30] ss:$8 sps:$4 sm:$0xff]  }
  0x60   :  { %664 = vmatprep.subr.bf16.mxu0 %v663_v12  ;;  %542 = vmatprep.subr.bf16.mxu1 %v685_v16  ;;  %v694_v22 = vld [vmem:[#allocation9 + $0x44] ss:$8 sps:$4 sm:$0xff]   ;;  %v696_v23 = vld [vmem:[#allocation9 + $0x40] ss:$8 sps:$4 sm:$0xff]   ;;  %v697_v24 = vld [vmem:[#allocation9 + $0x54] ss:$8 sps:$4 sm:$0xff]  }
  0x61   :  { %618 = vmatmul.mubr.msk.f32.vlgmr.msra.gmra.mrb[0].mxu0 %vm99_vm0, %v992_v8  ;;  %v699_v25 = vld [vmem:[#allocation9 + $0x50] ss:$8 sps:$4 sm:$0xff]   ;;  %v700_v26 = vld [vmem:[#allocation9 + $0x64] ss:$8 sps:$4 sm:$0xff]   ;;  %v702_v27 = vld [vmem:[#allocation9 + $0x60] ss:$8 sps:$4 sm:$0xff]  }
  0x62   :  { %666 = vmatpush1.bf16.msra.mxu0 %v665_v14  ;;  %242 = vmatprep.mubr.f32.mxu0 %v879_v0  ;;  %v703_v28 = vld [vmem:[#allocation9 + $0x74] ss:$8 sps:$4 sm:$0xff]   ;;  %v705_v29 = vld [vmem:[#allocation9 + $0x70] ss:$8 sps:$4 sm:$0xff]   ;;  %v706_v30 = vld [vmem:[#allocation9 + $0x84] ss:$8 sps:$4 sm:$0xff]  }
  0x63   :  { %543 = vmatpush1.bf16.msra.mxu1 %v687_v17  ;;  %v708_v31 = vld [vmem:[#allocation9 + $0x80] ss:$8 sps:$4 sm:$0xff]   ;;  %v709_v32 = vld [vmem:[#allocation9 + $0x94] ss:$8 sps:$4 sm:$0xff]   ;;  %v711_v33 = vld [vmem:[#allocation9 + $0x90] ss:$8 sps:$4 sm:$0xff]  }
  0x64   :  { %544 = vmatprep.subr.bf16.mxu1 %v688_v18  ;;  %v712_v34 = vld [vmem:[#allocation9 + $0xa4] ss:$8 sps:$4 sm:$0xff]   ;;  %v714_v35 = vld [vmem:[#allocation9 + $0xa0] ss:$8 sps:$4 sm:$0xff]   ;;  %v715_v36 = vld [vmem:[#allocation9 + $0xb4] ss:$8 sps:$4 sm:$0xff]  }
  0x65   :  { %619 = vmatmul.mubr.msk.f32.vlgmr.msra.gmra.mrb[2].mxu0 %vm99_vm0, %v992_v8  ;;  %v717_v37 = vld [vmem:[#allocation9 + $0xb0] ss:$8 sps:$4 sm:$0xff]   ;;  %v718_v38 = vld [vmem:[#allocation9 + $0xc4] ss:$8 sps:$4 sm:$0xff]   ;;  %v720_v39 = vld [vmem:[#allocation9 + $0xc0] ss:$8 sps:$4 sm:$0xff]  }
  0x66   :  { %366 = vmatprep.mubr.f32.mxu0 %v879_v0  ;;  %v721_v40 = vld [vmem:[#allocation9 + $0xd4] ss:$8 sps:$4 sm:$0xff]   ;;  %v723_v41 = vld [vmem:[#allocation9 + $0xd0] ss:$8 sps:$4 sm:$0xff]   ;;  %v724_v42 = vld [vmem:[#allocation9 + $0xe4] ss:$8 sps:$4 sm:$0xff]  }
  0x67   :  { %545 = vmatpush1.bf16.msra.mxu1 %v690_v19  ;;  %v726_v43 = vld [vmem:[#allocation9 + $0xe0] ss:$8 sps:$4 sm:$0xff]   ;;  %v297_v45 = vld [vmem:[#allocation11 + $0x18] sm:$0xff]  ;;  %v296_v48 = vld [vmem:[#allocation11 + $0x10] sm:$0xff]  ;;  %v585_v0 = vsub.s32 0, %v584_v63  ;;  %v589_v2 = vsub.s32 1, %v584_v63 }
  0x68   :  { %546 = vmatprep.subr.bf16.mxu1 %v691_v20  ;;  %v295_v44 = vld [vmem:[#allocation11 + $0x8] sm:$0xff]  ;;  %v294_v47 = vld [vmem:[#allocation11] sm:$0xff]  ;;  %v727_v49 = vld [vmem:[#allocation9 + $0xf4] ss:$8 sps:$4 sm:$0xff]  }
  0x69   :  { %v667_v46 = vpack.c.bf16 %v297_v45, %v295_v44  ;;  %v669_v50 = vpack.c.bf16 %v296_v48, %v294_v47  ;;  %v729_v51 = vld [vmem:[#allocation9 + $0xf0] ss:$8 sps:$4 sm:$0xff]  }
  0x6a   :  { %v581_v1 = vld [vmem:[%s1020_s5] sm:$0x3]  ;;  %s840_s5 = scalar_lea.vmem %s608_s13, 256 }
  0x6b   :  { %547 = vmatpush1.bf16.msra.mxu1 %v693_v21  ;;  %668 = vmatprep.subr.bf16.mxu0 %v667_v46  ;;  %v586_v3 = vrot.slane %v581_v1, %v585_v0  ;;  %v590_v5 = vrot.slane %v581_v1, %v589_v2  ;;  %p841_p12 = scmp.ne.s32.totalorder %s608_s13, %s840_s5  ;;  %p846_p0 = scmp.lt.s32.totalorder %s840_s5, %s840_s5 }
  0x6c   :  { %548 = vmatprep.subr.bf16.mxu1 %v694_v22  ;;  %670 = vmatpush1.bf16.msra.mxu0 %v669_v50 }
  0x6d   :  { %p847_p1 = por %p846_p0, %p845_p13 }
  0x6f   :  { %549 = vmatpush1.bf16.msra.mxu1 %v696_v23  ;;  %621 = vmatmul.mubr.msk.f32.vlgmr.msra.gmra.mrb[4].mxu0 %vm99_vm0, %v992_v8  ;;  %p848_p2 = pnand %p847_p1, %p841_p12 }
  0x70   :  { %550 = vmatprep.subr.bf16.mxu1 %v697_v24 }
  0x73   :  { %551 = vmatpush1.bf16.msra.mxu1 %v699_v25 }
  0x74   :  { %552 = vmatprep.subr.bf16.mxu1 %v700_v26 }
  0x77   :  { %553 = vmatpush1.bf16.msra.mxu1 %v702_v27 }
  0x78   :  { %554 = vmatprep.subr.bf16.mxu1 %v703_v28 }
  0x7b   :  { %555 = vmatpush1.bf16.msra.mxu1 %v705_v29 }
  0x7c   :  { %556 = vmatprep.subr.bf16.mxu1 %v706_v30 }
  0x7f   :  { %557 = vmatpush1.bf16.msra.mxu1 %v708_v31 }
  0x80   :  { %558 = vmatprep.subr.bf16.mxu1 %v709_v32 }
  0x83   :  { %559 = vmatpush1.bf16.msra.mxu1 %v711_v33 }
  0x84   :  { %560 = vmatprep.subr.bf16.mxu1 %v712_v34 }
  0x87   :  { %561 = vmatpush1.bf16.msra.mxu1 %v714_v35 }
  0x88   :  { %562 = vmatprep.subr.bf16.mxu1 %v715_v36 }
  0x8b   :  { %563 = vmatpush1.bf16.msra.mxu1 %v717_v37 }
  0x8c   :  { %564 = vmatprep.subr.bf16.mxu1 %v718_v38 }
  0x8f   :  { %565 = vmatpush1.bf16.msra.mxu1 %v720_v39 }
  0x90   :  { %566 = vmatprep.subr.bf16.mxu1 %v721_v40 }
  0x93   :  { %567 = vmatpush1.bf16.msra.mxu1 %v723_v41 }
  0x94   :  { %568 = vmatprep.subr.bf16.mxu1 %v724_v42 }
  0x97   :  { %569 = vmatpush1.bf16.msra.mxu1 %v726_v43 }
  0x98   :  { %570 = vmatprep.subr.bf16.mxu1 %v727_v49 }
  0x9b   :  { %571 = vmatpush1.bf16.msra.mxu1 %v729_v51 }
 0x134   :  { %v169_v52 = vpop.f32.mrb[0].mxu0 }
 0x135   :  { %v171_v53 = vpop.f32.mrb[1].mxu0 }
 0x138   :  { %v244_v54 = vpop.f32.mrb[2].mxu0 }
 0x139   :  { %v249_v55 = vmul.f32 %v244_v54, %v169_v52  ;;  %v246_v56 = vpop.f32.mrb[3].mxu0 }
 0x13a   :  { %v250_v57 = vmul.f32 %v246_v56, %v171_v53 }
 0x13b   :  { %v657_v59 = vpack.c.bf16 %v249_v55, %v249_v55 }
 0x13c   :  { %v658_v58 = vpack.c.bf16 %v250_v57, %v250_v57 }
 0x13e   :  { %572 = vmatprep.mubr.bf16.mxu1 %v658_v58 }
 0x13f   :  { %573 = vmatmul.mubr.bf16.vlgmr.msra.gmra.mrb[0].mxu1 %v657_v59 }
 0x142   :  { %v368_v60 = vpop.f32.mrb[4].mxu0 }
 0x143   :  { %v370_v61 = vpop.f32.mrb[5].mxu0 }
 0x212   :  { %v574_v4 = vpop.f32.mrb[0].mxu1 }
 0x213   :  { %v575_v6 = vadd.f32 %v574_v4, %v368_v60  ;;  %v576_v7 = vpop.f32.mrb[1].mxu1 }
 0x214   :  { %v577_v8 = vadd.f32 %v576_v7, %v370_v61  ;;  %v578_v9 = vpop.f32.mrb[2].mxu1 }
 0x215   :  { %v593_v10 = vadd.f32 %v586_v3, %v575_v6  ;;  %v579_v11 = vpop.f32.mrb[3].mxu1 }
 0x216   :  { %v594_v12 = vadd.f32 %v590_v5, %v577_v8 }
 0x217   :  { %v595_v13 = vmax.f32 %v593_v10, 0.0 }
 0x218   :  { %v596_v14 = vmax.f32 %v594_v12, 0.0 }
 0x219   :  { %v597_v15 = vsub.f32 0.0, %v595_v13 }
 0x21a   :  { %v598_v16 = vsub.f32 0.0, %v596_v14 }
 0x21b   :  { %599 = vst [vmem:[#allocation12] sm:$0xff] %v597_v15 }
 0x21c   :  { %600 = vst [vmem:[#allocation12 + $0x8] sm:$0xff] %v598_v16 }
 0x21d   :  { %851 = shalt.err (!%p848_p2)
}
 0x21e   :  { %s852_s14 = scalar_lea.hbm %s1021_s6, 256 }
 0x21f   :  { %p853_p3 = scmp.ne.s32.totalorder %s1021_s6, %s852_s14  ;;  %p856_p4 = scmp.lt.u32.totalorder %s852_s14, %s1021_s6 }
 0x221   :  { %p858_p5 = pnand %p856_p4, %p853_p3 }
 0x223   :  { %861 = shalt.err (!%p858_p5)
}
 0x224   :  { %610 = dma.vmem_to_hbm [thread:$0]  %s608_s13, 256, %s1021_s6, [#allocation5]  }
 0x225   :  { %868 = dma.done.wait [#allocation5], 256  }
 0x226   :  { %869 = vsyncadd [#allocation5], 4294967040 }
 0x227   :  { %614 = vsyncpa [#allocation4], 1 }
 0x228   :  { %615 = vsyncpa [#allocation7], 1 }
 0x229   :  { %616 = vsyncpa [#allocation10], 1 }
 0x22a   :  { %617 = vsyncpa [#allocation5], 1 }

</bundles_post_ra>
